<compile_context>
chip_gen: v7x
topology: tpu7x:2x2x1
jax: 0.10.0
libtpu: 0.0.40
codegen_flags: <defaults>
</compile_context>

<pallas_src>
import functools

import jax
import jax.numpy as jnp
from jax import lax
from jax.experimental import pallas as pl
from jax.experimental.pallas import tpu as pltpu


# ---------------------------------------------------------------------------
# Tiling / VMEM planning
# ---------------------------------------------------------------------------
def _vmem_plan():
    """Return (per-step input-block byte budget, vmem_limit_bytes).

    Generation aware: v5e/v6e have 128 MiB physical VMEM (big tiles, 48 MiB
    scoped limit); v7x has only 64 MiB, so keep the double-buffered footprint
    under ~24 MiB with a 32 MiB scoped limit.  Falls back to the v7x-safe plan
    if the hardware query is unavailable.
    """
    cap = None
    try:
        cap = pltpu.get_tpu_info().vmem_capacity_bytes
    except Exception:
        cap = None
    if cap is not None and cap > 96 * 1024 * 1024:       # v5e / v6e
        return 20 * 1024 * 1024, 48 * 1024 * 1024
    return 12 * 1024 * 1024, 32 * 1024 * 1024            # v7x-safe default


def _pick_tile(rows, bytes_per_row, budget):
    """Largest row-tile within `budget` bytes (single buffer), sublane-rounded."""
    tile = min(rows, max(1, budget // max(bytes_per_row, 1)))
    if tile < rows:
        tile = max(8, (tile // 8) * 8)
    return tile


# ---------------------------------------------------------------------------
# Kernels
# ---------------------------------------------------------------------------
def _nll_kernel_dense(pred_ref, cand_ref, out_ref, acc_ref, *, tile, n_elems, k):
    """Lane-dense path.

    pred block: (tile, 128) f32, the flat (N*C) log-prob stream.
    cand block: (tile, k)  i32, per 128-lane row the absolute flat indices of
                the (<= k) selected elements it can contain (-1 = none).
    """
    core = pl.program_id(0)
    i = pl.program_id(1)
    steps = pl.num_programs(1)

    @pl.when(i == 0)
    def _init():
        acc_ref[...] = jnp.zeros_like(acc_ref)

    pred = pred_ref[...]                               # (tr, 128) f32
    cand = cand_ref[...]                               # (tr, k)   i32
    tr = pred.shape[0]

    lane = lax.broadcasted_iota(jnp.int32, (tr, 128), 1)
    lrow = lax.broadcasted_iota(jnp.int32, (tr, 128), 0)
    logical_block = core * steps + i                   # un-clamped logical index
    flat = (logical_block * tile + lrow) * 128 + lane  # absolute flat element id

    # Bounded multi-candidate select: pure VPU compare+or, no gather.
    sel = jnp.zeros((tr, 128), dtype=jnp.bool_)
    for m in range(k):
        sel = sel | (flat == cand[:, m:m + 1])
    # Mask partial-tile padding and phantom (clamped) blocks.
    sel = sel & (flat < n_elems)

    acc_ref[...] += jnp.sum(jnp.where(sel, pred, jnp.float32(0.0)),
                            axis=0, keepdims=True)     # (1, 128) VPU partials

    @pl.when(i == steps - 1)
    def _finalize():
        row = lax.broadcasted_iota(jnp.int32, out_ref.shape, 0)
        out_ref[...] = jnp.where(row == 0, acc_ref[...], jnp.float32(0.0))


def _nll_kernel_rows(pred_ref, tgt_ref, out_ref, acc_ref, *, tile, n_rows):
    """Row-layout fallback.  pred block (tile, C); tgt block (tile, 1)."""
    core = pl.program_id(0)
    i = pl.program_id(1)
    steps = pl.num_programs(1)

    @pl.when(i == 0)
    def _init():
        acc_ref[...] = jnp.zeros_like(acc_ref)

    pred = pred_ref[...]                               # (tn, C) f32
    tgt = tgt_ref[...]                                 # (tn, 1) i32
    tn, c = pred.shape
    cls_ids = lax.broadcasted_iota(jnp.int32, (tn, c), 1)
    row_ids = (lax.broadcasted_iota(jnp.int32, (tn, c), 0)
               + (core * steps + i) * tile)
    sel = (cls_ids == tgt) & (row_ids < n_rows)        # mask padding / phantoms

    acc_ref[...] += jnp.sum(jnp.where(sel, pred, jnp.float32(0.0)),
                            axis=0, keepdims=True)     # (1, C) VPU partials

    @pl.when(i == steps - 1)
    def _finalize():
        total = jnp.sum(acc_ref[...])
        row = lax.broadcasted_iota(jnp.int32, out_ref.shape, 0)
        col = lax.broadcasted_iota(jnp.int32, out_ref.shape, 1)
        out_ref[...] = jnp.where((row == 0) & (col == 0), total, jnp.float32(0.0))


# ---------------------------------------------------------------------------
# Wrapper (== get_loss.forward)
# ---------------------------------------------------------------------------
def nll_loss_pallas(pred, target, trans_feat=None):
    """Equivalent of F.nll_loss(pred, target) with default 'mean' reduction."""
    del trans_feat  # unused by the reference module's forward
    n, c = pred.shape
    pred = pred.astype(jnp.float32)
    target = target.astype(jnp.int32)
    budget, vmem_limit = _vmem_plan()

    # Lane-dense streaming whenever the flat pred folds exactly into 128 lanes
    # (and C is not tiny, which would blow up the unrolled candidate select).
    use_dense = ((n * c) % 128 == 0) and (c >= 8)

    if use_dense:
        r = (n * c) // 128
        k = 127 // c + 2                      # max original rows per 128-lane row
        pred_in = pred.reshape(r, 128)        # lane-dense slab (layout plumbing)

        # Candidate table: absolute flat index of each possibly-selected element
        # per lane-row; -1 for candidates past the true N (never matches).
        base_row = (jnp.arange(r, dtype=jnp.int32) * 128) // c
        cand_rows = base_row[:, None] + jnp.arange(k, dtype=jnp.int32)[None, :]
        safe_rows = jnp.minimum(cand_rows, n - 1)
        cand = safe_rows * c + target[safe_rows]
        cand = jnp.where(cand_rows < n, cand, jnp.int32(-1))   # (r, k) int32

        per_row_bytes = 512 + 512             # pred + cand lane-rows (lane-padded VMEM)
        tile = _pick_tile(r, per_row_bytes, budget)
        rows_total, n_bound = r, n * c
        kernel = functools.partial(_nll_kernel_dense, tile=tile, n_elems=n_bound, k=k)
        lane_dims = (128, k)
        operands = (pred_in, cand)
        acc_scratch = pltpu.VMEM((1, 128), jnp.float32)
    else:
        pred_in = pred
        tgt_in = target.reshape(n, 1)
        lanes_c = 128 * ((c + 127) // 128)
        per_row_bytes = 4 * lanes_c + 512     # pred row + target row (lane-padded VMEM)
        tile = _pick_tile(n, per_row_bytes, budget)
        rows_total = n
        kernel = functools.partial(_nll_kernel_rows, tile=tile, n_rows=n)
        lane_dims = (c, 1)
        operands = (pred_in, tgt_in)
        acc_scratch = pltpu.VMEM((1, c), jnp.float32)

    steps_total = pl.cdiv(rows_total, tile)
    num_cores = 2 if steps_total >= 2 else 1  # v7x: split rows across both TCs
    half = pl.cdiv(steps_total, num_cores)
    last = steps_total - 1

    def row_block(cidx, i):
        # Clamp phantom steps to the last real block (their contribution is
        # masked to 0 in-kernel via the logical flat/row bound).
        return (jnp.minimum(cidx * half + i, last), 0)

    in_specs = [pl.BlockSpec((tile, lane_dims[0]), row_block),
                pl.BlockSpec((tile, lane_dims[1]), row_block)]

    out = pl.pallas_call(
        kernel,
        out_shape=jax.ShapeDtypeStruct((num_cores * 8, 128), jnp.float32),
        grid_spec=pltpu.PrefetchScalarGridSpec(
            num_scalar_prefetch=0,
            grid=(num_cores, half),
            in_specs=in_specs,
            # Constant block index along the reduction axis -> per-core partial
            # stays VMEM-resident; single HBM writeback per core.
            out_specs=pl.BlockSpec((8, 128), lambda cidx, i: (cidx, 0)),
            scratch_shapes=[acc_scratch],
        ),
        compiler_params=pltpu.CompilerParams(
            dimension_semantics=("parallel", "arbitrary"),
            vmem_limit_bytes=vmem_limit,
        ),
        cost_estimate=pl.CostEstimate(
            flops=2 * n * c,
            transcendentals=0,
            bytes_accessed=n * c * 4 + n * 4 + num_cores * 8 * 128 * 4,
        ),
    )(*operands)

    # Combine per-core / per-lane partial sums and apply the mean + negation.
    return -jnp.sum(out) / jnp.float32(n)


# ---------------------------------------------------------------------------
# Self-test
# ---------------------------------------------------------------------------
if __name__ == "__main__":
    key = jax.random.PRNGKey(0)
    keys = jax.random.split(key, 8)

    def _ref_nll(p, t):
        return -jnp.mean(p[jnp.arange(p.shape[0]), t])

    # Case 1: generalized lane-dense path (C=40 does not divide 128, N*C%128==0).
    n1, c1 = 16, 40
    pred1 = jax.nn.log_softmax(jax.random.normal(keys[0], (n1, c1), jnp.float32), -1)
    tgt1 = jax.random.randint(keys[1], (n1,), 0, c1, dtype=jnp.int32)
    trans_feat = jax.random.normal(keys[2], (n1, 3, 3), dtype=jnp.float32)
    loss1 = jax.block_until_ready(nll_loss_pallas(pred1, tgt1, trans_feat))
    assert jnp.allclose(loss1, _ref_nll(pred1, tgt1), atol=1e-6, rtol=1e-6), loss1

    # Case 2: aligned lane-dense path (C divides 128).
    n2, c2 = 8, 32
    pred2 = jax.nn.log_softmax(jax.random.normal(keys[3], (n2, c2), jnp.float32), -1)
    tgt2 = jax.random.randint(keys[4], (n2,), 0, c2, dtype=jnp.int32)
    loss2 = jax.block_until_ready(nll_loss_pallas(pred2, tgt2, None))
    assert jnp.allclose(loss2, _ref_nll(pred2, tgt2), atol=1e-6, rtol=1e-6), loss2

    # Case 3: row-layout fallback (N*C not a multiple of 128).
    n3, c3 = 6, 10
    pred3 = jax.nn.log_softmax(jax.random.normal(keys[5], (n3, c3), jnp.float32), -1)
    tgt3 = jax.random.randint(keys[6], (n3,), 0, c3, dtype=jnp.int32)
    loss3 = jax.block_until_ready(nll_loss_pallas(pred3, tgt3, None))
    assert jnp.allclose(loss3, _ref_nll(pred3, tgt3), atol=1e-6, rtol=1e-6), loss3

    print("KERNEL_OK")
</pallas_src>

<mosaic_0001>
module attributes {stable_mosaic.version = 11 : i64} {
  func.func @_nll_kernel_dense(%arg0: i32, %arg1: i32, %arg2: memref<5x128xf32, #tpu.memory_space<vmem>>, %arg3: memref<5x5xi32, #tpu.memory_space<vmem>>, %arg4: memref<8x128xf32, #tpu.memory_space<vmem>>, %arg5: memref<1x128xf32, #tpu.memory_space<vmem>>) attributes {dimension_semantics = [#tpu.dimension_semantics<parallel>, #tpu.dimension_semantics<arbitrary>], iteration_bounds = array<i64: 1, 1>, scalar_prefetch = 0 : i64, scratch_operands = 1 : i64, tpu.core_type = #tpu.core_type<tc>, window_params = [{transform_indices = @transform_0, window_bounds = array<i64: 5, 128>}, {transform_indices = @transform_1, window_bounds = array<i64: 5, 5>}, {transform_indices = @transform_2, window_bounds = array<i64: 8, 128>}]} {
    %c0_i32 = arith.constant 0 : i32
    %0 = arith.cmpi eq, %arg1, %c0_i32 : i32
    %1 = arith.extui %0 : i1 to i32
    %c0_i32_0 = arith.constant 0 : i32
    %2 = arith.cmpi ne, %1, %c0_i32_0 : i32
    scf.if %2 {
      %cst_11 = arith.constant 0.000000e+00 : f32
      %49 = vector.broadcast %cst_11 : f32 to vector<1x128xf32>
      %c0_12 = arith.constant 0 : index
      %c0_13 = arith.constant 0 : index
      %50 = vector.load %arg5[%c0_12, %c0_13] : memref<1x128xf32, #tpu.memory_space<vmem>>, vector<1x128xf32>
      tpu.vector_store %arg5[%c0_12, %c0_13], %49 {strides = array<i32>} : memref<1x128xf32, #tpu.memory_space<vmem>>, vector<1x128xf32>,
    } else {
    }
    %c0 = arith.constant 0 : index
    %c0_1 = arith.constant 0 : index
    %3 = vector.load %arg2[%c0, %c0_1] : memref<5x128xf32, #tpu.memory_space<vmem>>, vector<5x128xf32>
    %c0_2 = arith.constant 0 : index
    %c0_3 = arith.constant 0 : index
    %4 = vector.load %arg3[%c0_2, %c0_3] : memref<5x5xi32, #tpu.memory_space<vmem>>, vector<5x5xi32>
    %5 = tpu.iota {dimensions = array<i32: 1>} : vector<5x128xi32>
    %6 = tpu.iota {dimensions = array<i32: 0>} : vector<5x128xi32>
    %c1_i32 = arith.constant 1 : i32
    %7 = arith.muli %arg0, %c1_i32 : i32
    %8 = arith.addi %7, %arg1 : i32
    %c5_i32 = arith.constant 5 : i32
    %9 = arith.muli %8, %c5_i32 : i32
    %10 = vector.broadcast %9 : i32 to vector<5x128xi32>
    %11 = arith.addi %10, %6 : vector<5x128xi32>
    %c128_i32 = arith.constant 128 : i32
    %12 = vector.broadcast %c128_i32 : i32 to vector<5x128xi32>
    %13 = arith.muli %11, %12 : vector<5x128xi32>
    %14 = arith.addi %13, %5 : vector<5x128xi32>
    %false = arith.constant false
    %15 = vector.broadcast %false : i1 to vector<5x128xi1>
    %16 = vector.extract_strided_slice %4 {offsets = [0, 0], sizes = [5, 1], strides = [1, 1]} : vector<5x5xi32> to vector<5x1xi32>
    %17 = vector.broadcast %16 : vector<5x1xi32> to vector<5x128xi32>
    %18 = arith.cmpi eq, %14, %17 : vector<5x128xi32>
    %19 = arith.ori %15, %18 : vector<5x128xi1>
    %20 = vector.extract_strided_slice %4 {offsets = [0, 1], sizes = [5, 1], strides = [1, 1]} : vector<5x5xi32> to vector<5x1xi32>
    %21 = vector.broadcast %20 : vector<5x1xi32> to vector<5x128xi32>
    %22 = arith.cmpi eq, %14, %21 : vector<5x128xi32>
    %23 = arith.ori %19, %22 : vector<5x128xi1>
    %24 = vector.extract_strided_slice %4 {offsets = [0, 2], sizes = [5, 1], strides = [1, 1]} : vector<5x5xi32> to vector<5x1xi32>
    %25 = vector.broadcast %24 : vector<5x1xi32> to vector<5x128xi32>
    %26 = arith.cmpi eq, %14, %25 : vector<5x128xi32>
    %27 = arith.ori %23, %26 : vector<5x128xi1>
    %28 = vector.extract_strided_slice %4 {offsets = [0, 3], sizes = [5, 1], strides = [1, 1]} : vector<5x5xi32> to vector<5x1xi32>
    %29 = vector.broadcast %28 : vector<5x1xi32> to vector<5x128xi32>
    %30 = arith.cmpi eq, %14, %29 : vector<5x128xi32>
    %31 = arith.ori %27, %30 : vector<5x128xi1>
    %32 = vector.extract_strided_slice %4 {offsets = [0, 4], sizes = [5, 1], strides = [1, 1]} : vector<5x5xi32> to vector<5x1xi32>
    %33 = vector.broadcast %32 : vector<5x1xi32> to vector<5x128xi32>
    %34 = arith.cmpi eq, %14, %33 : vector<5x128xi32>
    %35 = arith.ori %31, %34 : vector<5x128xi1>
    %c640_i32 = arith.constant 640 : i32
    %36 = vector.broadcast %c640_i32 : i32 to vector<5x128xi32>
    %37 = arith.cmpi slt, %14, %36 : vector<5x128xi32>
    %38 = arith.andi %35, %37 : vector<5x128xi1>
    %c0_4 = arith.constant 0 : index
    %c0_5 = arith.constant 0 : index
    %39 = vector.load %arg5[%c0_4, %c0_5] : memref<1x128xf32, #tpu.memory_space<vmem>>, vector<1x128xf32>
    %cst = arith.constant 0.000000e+00 : f32
    %40 = vector.broadcast %cst : f32 to vector<5x128xf32>
    %41 = arith.select %38, %3, %40 : vector<5x128xi1>, vector<5x128xf32>
    %cst_6 = arith.constant dense<0.000000e+00> : vector<128xf32>
    %42 = vector.multi_reduction <add>, %41, %cst_6 [0] : vector<5x128xf32> to vector<128xf32>
    %43 = vector.shape_cast %42 : vector<128xf32> to vector<1x128xf32>
    %44 = arith.addf %39, %43 : vector<1x128xf32>
    %c0_7 = arith.constant 0 : index
    %c0_8 = arith.constant 0 : index
    %45 = vector.load %arg5[%c0_7, %c0_8] : memref<1x128xf32, #tpu.memory_space<vmem>>, vector<1x128xf32>
    tpu.vector_store %arg5[%c0_7, %c0_8], %44 {strides = array<i32>} : memref<1x128xf32, #tpu.memory_space<vmem>>, vector<1x128xf32>,
    %c0_i32_9 = arith.constant 0 : i32
    %46 = arith.cmpi eq, %arg1, %c0_i32_9 : i32
    %47 = arith.extui %46 : i1 to i32
    %c0_i32_10 = arith.constant 0 : i32
    %48 = arith.cmpi ne, %47, %c0_i32_10 : i32
    scf.if %48 {
      %49 = tpu.iota {dimensions = array<i32: 0>} : vector<8x128xi32>
      %c0_i32_11 = arith.constant 0 : i32
      %50 = vector.broadcast %c0_i32_11 : i32 to vector<8x128xi32>
      %51 = arith.cmpi eq, %49, %50 : vector<8x128xi32>
      %c0_12 = arith.constant 0 : index
      %c0_13 = arith.constant 0 : index
      %52 = vector.load %arg5[%c0_12, %c0_13] : memref<1x128xf32, #tpu.memory_space<vmem>>, vector<1x128xf32>
      %cst_14 = arith.constant 0.000000e+00 : f32
      %53 = vector.shape_cast %52 : vector<1x128xf32> to vector<1x128xf32>
      %54 = vector.broadcast %53 : vector<1x128xf32> to vector<8x128xf32>
      %55 = vector.broadcast %cst_14 : f32 to vector<8x128xf32>
      %56 = arith.select %51, %54, %55 : vector<8x128xi1>, vector<8x128xf32>
      %c0_15 = arith.constant 0 : index
      %c0_16 = arith.constant 0 : index
      %57 = vector.load %arg4[%c0_15, %c0_16] : memref<8x128xf32, #tpu.memory_space<vmem>>, vector<8x128xf32>
      tpu.vector_store %arg4[%c0_15, %c0_16], %56 {strides = array<i32>} : memref<8x128xf32, #tpu.memory_space<vmem>>, vector<8x128xf32>,
    } else {
    }
    return
  }
  func.func @transform_0(%arg0: i32, %arg1: i32) -> (i32, i32) {
    %c1_i32 = arith.constant 1 : i32
    %0 = arith.muli %arg0, %c1_i32 : i32
    %1 = arith.addi %0, %arg1 : i32
    %c0_i32 = arith.constant 0 : i32
    %2 = arith.minsi %1, %c0_i32 : i32
    %c0_i32_0 = arith.constant 0 : i32
    %c0_i32_1 = arith.constant 0 : i32
    return %2, %c0_i32_0 : i32, i32
  }
  func.func @transform_1(%arg0: i32, %arg1: i32) -> (i32, i32) {
    %c1_i32 = arith.constant 1 : i32
    %0 = arith.muli %arg0, %c1_i32 : i32
    %1 = arith.addi %0, %arg1 : i32
    %c0_i32 = arith.constant 0 : i32
    %2 = arith.minsi %1, %c0_i32 : i32
    %c0_i32_0 = arith.constant 0 : i32
    %c0_i32_1 = arith.constant 0 : i32
    return %2, %c0_i32_0 : i32, i32
  }
  func.func @transform_2(%arg0: i32, %arg1: i32) -> (i32, i32) {
    %c0_i32 = arith.constant 0 : i32
    %c0_i32_0 = arith.constant 0 : i32
    return %arg0, %c0_i32 : i32, i32
  }
}

</mosaic_0001>

<bundles_post_ra>
// kernel: tpu_custom_call.1
= control target key start
LH: loop header
LB: loop body
LE: loop exit
PB: predicated region body
PF: predicated region fallthrough
CT: control target
= control target key end

     0   :  { %7 = vsyncpa [#allocation4], 0  ;;  %s288_s0 = inlined_call_operand.hbm [shape: f32[5,128], index: 0, kind: input, shape index: {}]   ;;  %s289_s1 = inlined_call_operand.hbm [shape: s32[5,5], index: 1, kind: input, shape index: {}]   ;;  %s290_s2 = inlined_call_operand.hbm [shape: f32[8,128], index: 2, kind: output, shape index: {}]  }
   0x1   :  { %8 = vsyncpa [#allocation7], 0 }
   0x2   :  { %9 = vsyncpa [#allocation5], 0  ;;  %s228_s9 = smov [#allocation3]   ;;  %s229_s11 = smov [#allocation6]  }
   0x3   :  { %s21_s10 = sshll.u32 %s228_s9, 4  ;;  %s36_s12 = sshll.u32 %s229_s11, 4  ;;  %s22_s10 = int_to_ptr.vmem [resolvable:$true] %s21_s10  ;;  %s37_s12 = int_to_ptr.vmem [resolvable:$true] %s36_s12 }
   0x4   :  { %s156_s15 = scalar_lea.hbm %s288_s0, 128 }
   0x5   :  { %p157_p0 = scmp.ne.s32.totalorder %s288_s0, %s156_s15  ;;  %p160_p1 = scmp.lt.u32.totalorder %s156_s15, %s288_s0 }
   0x7   :  { %p162_p2 = pnand %p160_p1, %p157_p0 }
   0x9   :  { %165 = shalt.err (!%p162_p2)
}
   0xa   :  { %s166_s20 = scalar_lea.vmem %s22_s10, 128  ;;  %p171_p4 = scmp.lt.s32.totalorder %s22_s10, %s22_s10 }
   0xb   :  { %p167_p3 = scmp.ne.s32.totalorder %s22_s10, %s166_s20  ;;  %p172_p5 = scmp.lt.s32.totalorder %s166_s20, %s166_s20 }
   0xd   :  { %p173_p6 = por %p172_p5, %p171_p4 }
   0xf   :  { %p174_p7 = pnand %p173_p6, %p167_p3 }
  0x11   :  { %177 = shalt.err (!%p174_p7)
}
  0x12   :  { %24 = dma.hbm_to_vmem [thread:$0]  %s288_s0, 128, %s22_s10, [#allocation4]  }
  0x13   :  { %s178_s25 = scalar_lea.hbm %s289_s1, 128 }
  0x14   :  { %p179_p8 = scmp.ne.s32.totalorder %s289_s1, %s178_s25  ;;  %p182_p9 = scmp.lt.u32.totalorder %s178_s25, %s289_s1 }
  0x16   :  { %p184_p10 = pnand %p182_p9, %p179_p8 }
  0x18   :  { %187 = shalt.err (!%p184_p10)
}
  0x19   :  { %s188_s30 = scalar_lea.vmem %s37_s12, 128  ;;  %p193_p12 = scmp.lt.s32.totalorder %s37_s12, %s37_s12 }
  0x1a   :  { %p189_p11 = scmp.ne.s32.totalorder %s37_s12, %s188_s30  ;;  %p194_p13 = scmp.lt.s32.totalorder %s188_s30, %s188_s30 }
  0x1c   :  { %p195_p0 = por %p194_p13, %p193_p12 }
  0x1e   :  { %p196_p1 = pnand %p195_p0, %p189_p11 }
  0x20   :  { %199 = shalt.err (!%p196_p1)
}
  0x21   :  { %39 = dma.hbm_to_vmem [thread:$0]  %s289_s1, 128, %s37_s12, [#allocation7]  }
  0x22   :  { %222 = dma.done.wait [#allocation4], 128  }
  0x23   :  { %223 = vsyncadd [#allocation4], 4294967168 }
  0x24   :  { %224 = dma.done.wait [#allocation7], 128  }
  0x25   :  { %225 = vsyncadd [#allocation7], 4294967168  ;;  %v230_v0 = vmov 0.0   ;;  %v231_v1 = vmov 2   ;;  %v232_v2 = vmov 0   ;;  %v233_v4 = vmov 3  }
  0x26   :  { %56 = vst [vmem:[#allocation2] sm:$0x1] %v230_v0  ;;  %152 = vset.pattern.permute.xlu1 %v231_v1  ;;  %150 = vset.pattern.permute.xlu0 %v232_v2  ;;  %v58_v3 = vld [vmem:[#allocation6] sm:$0x1f]  ;;  %v234_v5 = vmov 1   ;;  %v235_v6 = vmov 4   ;;  %v59_v7 = vlaneseq }
  0x27   :  { %79 = vperm.xlu1 %152, %v58_v3   ;;  %70 = vperm.xlu0 %150, %v58_v3   ;;  %v57_v17 = vld [vmem:[#allocation3] sm:$0x1f]  ;;  %vm97_vm9 = vcmask 1044480   ;;  %s236_s1 = smov [#allocation8]  }
  0x28   :  { %v62_v8 = vshrl.u32 %v59_v7, 7  ;;  %v60_v9 = vand.u32 127, %v59_v7  ;;  %s126_s4 = sshll.u32 %s236_s1, 4  ;;  %s127_s4 = int_to_ptr.vmem [resolvable:$true] %s126_s4 }
  0x29   :  { %s200_s5 = scalar_lea.vmem %s127_s4, 128  ;;  %p205_p3 = scmp.lt.s32.totalorder %s127_s4, %s127_s4 }
  0x2a   :  { %v67_v10 = vmul.u32 128, %v62_v8  ;;  %vm110_vm12 = vcmp.eq.s32.totalorder %v62_v8, 0  ;;  %p201_p2 = scmp.ne.s32.totalorder %s127_s4, %s200_s5  ;;  %p206_p4 = scmp.lt.s32.totalorder %s200_s5, %s200_s5 }
  0x2b   :  { %153 = vset.pattern.permute.xlu1 %v233_v4  ;;  %151 = vset.pattern.permute.xlu0 %v234_v5 }
  0x2c   :  { %84 = vperm.xlu1 %153, %v58_v3   ;;  %74 = vperm.xlu0 %151, %v58_v3   ;;  %v68_v13 = vadd.s32 %v67_v10, %v60_v9  ;;  %p207_p5 = por %p206_p4, %p205_p3 }
  0x2d   :  { %v95_v25 = vld [vmem:[#allocation2] sm:$0x1] }
  0x2e   :  { %vm93_vm6 = vcmp.lt.s32.totalorder %v68_v13, 640  ;;  %p208_p6 = pnand %p207_p5, %p201_p2 }
  0x30   :  { %154 = vset.pattern.permute.xlu1 %v235_v6  ;;  %155 = vset.pattern.permute.xlu0 %v235_v6 }
  0x31   :  { %89 = vperm.xlu1 %154, %v58_v3  }
  0xa6   :  { %v80_v11 = vpop.permute.xlu1 %79  ;;  %v71_v12 = vpop.permute.xlu0 %70 }
  0xa7   :  { %vm72_vm0 = vcmp.eq.s32.totalorder %v68_v13, %v71_v12  ;;  %vm81_vm2 = vcmp.eq.s32.totalorder %v68_v13, %v80_v11 }
  0xab   :  { %v85_v14 = vpop.permute.xlu1 %84  ;;  %v75_v15 = vpop.permute.xlu0 %74 }
  0xac   :  { %vm76_vm1 = vcmp.eq.s32.totalorder %v68_v13, %v75_v15  ;;  %vm86_vm5 = vcmp.eq.s32.totalorder %v68_v13, %v85_v14 }
  0xad   :  { %vm77_vm3 = vmor %vm72_vm0, %vm76_vm1 }
  0xae   :  { %vm82_vm4 = vmor %vm77_vm3, %vm81_vm2 }
  0xaf   :  { %vm87_vm7 = vmor %vm82_vm4, %vm86_vm5 }
  0xb0   :  { %v90_v16 = vpop.permute.xlu1 %89 }
  0xb1   :  { %vm91_vm8 = vcmp.eq.s32.totalorder %v68_v13, %v90_v16 }
  0xb2   :  { %vm92_vm10 = vmor %vm87_vm7, %vm91_vm8 }
  0xb3   :  { %vm94_vm11 = vmand %vm92_vm10, %vm93_vm6 }
  0xb4   :  { %v96_v18 = vsel %vm94_vm11, %v57_v17, 0.0 }
  0xb5   :  { %v98_v19 = vsel %vm97_vm9, %v96_v18, 0.0 }
  0xb6   :  { %v99_v20 = vrot.slane %v98_v19, 4 }
  0xb8   :  { %v100_v21 = vadd.f32 %v99_v20, %v98_v19 }
  0xba   :  { %v101_v22 = vrot.slane %v100_v21, 2 }
  0xbc   :  { %v102_v23 = vadd.f32 %v101_v22, %v100_v21 }
  0xbe   :  { %v103_v24 = vrot.slane %v102_v23, 1 }
  0xc0   :  { %v104_v26 = vadd.f32 %v103_v24, %v102_v23 }
  0xc2   :  { %v105_v27 = vadd.f32 %v104_v26, %v95_v25 }
  0xc4   :  { %106 = vst [vmem:[#allocation2] sm:$0x1] %v105_v27 }
  0xcb   :  { %v140_v28 = vld [vmem:[#allocation2] ss:$0 sm:$0xff] }
  0xcc   :  { %v118_v29 = vsel %vm110_vm12, %v140_v28, 0.0 }
  0xcd   :  { %119 = vst [vmem:[#allocation8] sm:$0xff] %v118_v29 }
  0xce   :  { %211 = shalt.err (!%p208_p6)
}
  0xcf   :  { %s212_s8 = scalar_lea.hbm %s290_s2, 128 }
  0xd0   :  { %p213_p7 = scmp.ne.s32.totalorder %s290_s2, %s212_s8  ;;  %p216_p8 = scmp.lt.u32.totalorder %s212_s8, %s290_s2 }
  0xd2   :  { %p218_p9 = pnand %p216_p8, %p213_p7 }
  0xd4   :  { %221 = shalt.err (!%p218_p9)
}
  0xd5   :  { %129 = dma.vmem_to_hbm [thread:$0]  %s127_s4, 128, %s290_s2, [#allocation5]  }
  0xd6   :  { %226 = dma.done.wait [#allocation5], 128  }
  0xd7   :  { %227 = vsyncadd [#allocation5], 4294967168 }
  0xd8   :  { %133 = vsyncpa [#allocation4], 1 }
  0xd9   :  { %134 = vsyncpa [#allocation7], 1 }
  0xda   :  { %135 = vsyncpa [#allocation5], 1 }

</bundles_post_ra>
